<compile_context>
chip_gen: v5e
topology: v5e:2x2
jax: 0.10.0
libtpu: 0.0.40
codegen_flags: <defaults>
</compile_context>

<pallas_src>
import functools

import numpy as np
import jax
import jax.numpy as jnp
from jax.experimental import pallas as pl
from jax.experimental.pallas import tpu as pltpu


def _round_up(x, m):
    return ((x + m - 1) // m) * m


def _fce_loss_kernel(pred_ref, teacher_ref, wvec_ref, loss_ref, *, batch, tile_b):
    # pred_ref   : [C, TILE_B]  native dtype (transposed: classes on sublanes)
    # teacher_ref: [1, TILE_B]  int32 labels
    # wvec_ref   : [C, 1]       f32 per-class weights
    # loss_ref   : [1, TILE_B]  f32 per-sample loss (padded samples -> 0)
    pred = pred_ref[...].astype(jnp.float32)                          # [C, T]
    teacher = teacher_ref[...]                                        # [1, T]

    # In-kernel one-hot: class index along sublanes vs. per-sample label.
    class_iota = jax.lax.broadcasted_iota(jnp.int32, pred.shape, 0)   # [C, T]
    onehot = (class_iota == teacher).astype(jnp.float32)              # [C, T]

    # Per-sample weight per_cls_weights[0, teacher[i]] via VPU multiply+reduce.
    w_i = jnp.sum(onehot * wvec_ref[...], axis=0, keepdims=True)      # [1, T]

    sup_mask = 1.0 - onehot                                           # zero at true class
    pos_mask = (pred > 0.0).astype(jnp.float32)                       # mask_vector
    supsup = sup_mask * w_i * pos_mask                                # [C, T]

    # head_softmax(pred, supsup): reductions over the class (sublane) axis.
    x = jnp.exp(pred - jnp.max(pred, axis=0, keepdims=True))          # [C, T]
    yk = jnp.sum(x * supsup, axis=0, keepdims=True) / jnp.sum(x, axis=0, keepdims=True)

    loss = -jnp.log(1.0 - yk + 1e-7)                                  # [1, T]

    # Mask out padded samples so the wrapper's sum / B is exact.
    lane = jax.lax.broadcasted_iota(jnp.int32, loss.shape, 1)         # [1, T]
    global_idx = pl.program_id(0) * tile_b + lane
    loss_ref[...] = jnp.where(global_idx < batch, loss, 0.0)


def fce_loss_beta(pred, teacher, per_cls_weights, *, tile_b=512):
    """pred: [B, C] logits (any float dtype), teacher: [B] int labels,
    per_cls_weights: [1, C] f32.  Returns scalar mean loss (f32)."""
    B, C = pred.shape

    # Lane-dense tiling along batch: TILE_B multiple of 128, capped by padded B.
    tile_b = max(128, min(tile_b, _round_up(B, 128)))
    b_pad = _round_up(B, tile_b)
    num_tiles = b_pad // tile_b

    # Layout plumbing (no compute): transpose so batch is the lane dim, pad.
    pred_t = jnp.pad(pred.T, ((0, 0), (0, b_pad - B)))                       # [C, B_pad]
    teacher_p = jnp.pad(teacher.astype(jnp.int32), (0, b_pad - B)).reshape(1, b_pad)
    wvec = jnp.asarray(per_cls_weights, dtype=jnp.float32).reshape(C, 1)     # [C, 1]

    per_sample = pl.pallas_call(
        functools.partial(_fce_loss_kernel, batch=B, tile_b=tile_b),
        out_shape=jax.ShapeDtypeStruct((1, b_pad), jnp.float32),
        grid=(num_tiles,),
        in_specs=[
            pl.BlockSpec((C, tile_b), lambda i: (0, i)),   # pred (native dtype)
            pl.BlockSpec((1, tile_b), lambda i: (0, i)),   # teacher labels
            pl.BlockSpec((C, 1), lambda i: (0, 0)),        # per-class weights
        ],
        out_specs=pl.BlockSpec((1, tile_b), lambda i: (0, i)),
        compiler_params=pltpu.CompilerParams(dimension_semantics=("parallel",)),
    )(pred_t, teacher_p, wvec)

    # Final scalar reduction (padded rows already zeroed in-kernel).
    return jnp.sum(per_sample) / B


def _reference(pred, teacher, per_cls_weights):
    """Pure-JAX reference mirroring the PyTorch forward exactly."""
    B, C = pred.shape
    onehot = jnp.eye(C, dtype=jnp.float32)[teacher]
    sup_mask = 1.0 - onehot
    w_i = per_cls_weights[0, teacher][:, None]
    pos_mask = (pred > 0).astype(jnp.float32)
    supsup = sup_mask * w_i * pos_mask
    x = jnp.exp(pred.astype(jnp.float32) - jnp.max(pred, axis=1, keepdims=True))
    yk = jnp.sum(x * supsup, axis=1) / jnp.sum(x, axis=1)
    return jnp.mean(-jnp.log(1.0 - yk + 1e-7))


if __name__ == "__main__":
    n_classes = 10
    batch = 8

    # Deterministic "parameter" setup, mirroring __init__ (only the last row of
    # the loop survives due to the indentation in the original code):
    #   w[j] = 1 if cls_num[-1] < cls_num[j] else 0
    cls_num = np.array([5000, 3000, 2000, 1500, 1000, 800, 600, 400, 200, 100])
    w_last = np.where(cls_num[-1] < cls_num, 1, 0)
    per_cls_weights = jnp.asarray(w_last[None, :], dtype=jnp.float32)   # [1, n_classes]

    key = jax.random.PRNGKey(0)
    kp, kt = jax.random.split(key)
    pred = jax.random.normal(kp, (batch, n_classes), dtype=jnp.float32)
    teacher = jax.random.randint(kt, (batch,), 0, n_classes, dtype=jnp.int32)

    loss = fce_loss_beta(pred, teacher, per_cls_weights)
    loss = jax.block_until_ready(loss)

    ref = _reference(pred, teacher, per_cls_weights)
    assert np.allclose(np.asarray(loss), np.asarray(ref), rtol=1e-5, atol=1e-6), (
        f"mismatch: kernel={loss} ref={ref}"
    )
    print("KERNEL_OK")
</pallas_src>

<mosaic_0001>
module attributes {stable_mosaic.version = 11 : i64} {
  func.func @_fce_loss_kernel(%arg0: i32, %arg1: memref<10x128xf32, #tpu.memory_space<vmem>>, %arg2: memref<1x128xi32, #tpu.memory_space<vmem>>, %arg3: memref<10x1xf32, #tpu.memory_space<vmem>>, %arg4: memref<1x128xf32, #tpu.memory_space<vmem>>) attributes {dimension_semantics = [#tpu.dimension_semantics<parallel>], iteration_bounds = array<i64: 1>, scalar_prefetch = 0 : i64, scratch_operands = 0 : i64, tpu.core_type = #tpu.core_type<tc>, window_params = [{transform_indices = @transform_0, window_bounds = array<i64: 10, 128>}, {transform_indices = @transform_1, window_bounds = array<i64: 1, 128>}, {pipeline_mode = #tpu.pipeline_mode<synchronous>, transform_indices = @transform_2, window_bounds = array<i64: 10, 1>}, {transform_indices = @transform_3, window_bounds = array<i64: 1, 128>}]} {
    %c0 = arith.constant 0 : index
    %c0_0 = arith.constant 0 : index
    %0 = vector.load %arg1[%c0, %c0_0] : memref<10x128xf32, #tpu.memory_space<vmem>>, vector<10x128xf32>
    %c0_1 = arith.constant 0 : index
    %c0_2 = arith.constant 0 : index
    %1 = vector.load %arg2[%c0_1, %c0_2] : memref<1x128xi32, #tpu.memory_space<vmem>>, vector<1x128xi32>
    %2 = tpu.iota {dimensions = array<i32: 0>} : vector<10x128xi32>
    %3 = vector.broadcast %1 : vector<1x128xi32> to vector<10x128xi32>
    %4 = arith.cmpi eq, %2, %3 : vector<10x128xi32>
    %5 = arith.extui %4 : vector<10x128xi1> to vector<10x128xi32>
    %6 = arith.sitofp %5 : vector<10x128xi32> to vector<10x128xf32>
    %c0_3 = arith.constant 0 : index
    %c0_4 = arith.constant 0 : index
    %7 = vector.load %arg3[%c0_3, %c0_4] : memref<10x1xf32, #tpu.memory_space<vmem>>, vector<10x1xf32>
    %8 = vector.broadcast %7 : vector<10x1xf32> to vector<10x128xf32>
    %9 = arith.mulf %6, %8 : vector<10x128xf32>
    %cst = arith.constant dense<0.000000e+00> : vector<128xf32>
    %10 = vector.multi_reduction <add>, %9, %cst [0] : vector<10x128xf32> to vector<128xf32>
    %11 = vector.shape_cast %10 : vector<128xf32> to vector<1x128xf32>
    %cst_5 = arith.constant 1.000000e+00 : f32
    %12 = vector.broadcast %cst_5 : f32 to vector<10x128xf32>
    %13 = arith.subf %12, %6 : vector<10x128xf32>
    %cst_6 = arith.constant 0.000000e+00 : f32
    %14 = vector.broadcast %cst_6 : f32 to vector<10x128xf32>
    %15 = arith.cmpf ogt, %0, %14 : vector<10x128xf32>
    %16 = arith.extui %15 : vector<10x128xi1> to vector<10x128xi32>
    %17 = arith.sitofp %16 : vector<10x128xi32> to vector<10x128xf32>
    %18 = vector.broadcast %11 : vector<1x128xf32> to vector<10x128xf32>
    %19 = arith.mulf %13, %18 : vector<10x128xf32>
    %20 = arith.mulf %19, %17 : vector<10x128xf32>
    %cst_7 = arith.constant dense<0xFF800000> : vector<128xf32>
    %21 = vector.multi_reduction <maximumf>, %0, %cst_7 [0] : vector<10x128xf32> to vector<128xf32>
    %22 = vector.shape_cast %21 : vector<128xf32> to vector<1x128xf32>
    %23 = vector.broadcast %22 : vector<1x128xf32> to vector<10x128xf32>
    %24 = arith.subf %0, %23 : vector<10x128xf32>
    %25 = math.exp %24 : vector<10x128xf32>
    %26 = arith.mulf %25, %20 : vector<10x128xf32>
    %cst_8 = arith.constant dense<0.000000e+00> : vector<128xf32>
    %27 = vector.multi_reduction <add>, %26, %cst_8 [0] : vector<10x128xf32> to vector<128xf32>
    %28 = vector.shape_cast %27 : vector<128xf32> to vector<1x128xf32>
    %cst_9 = arith.constant dense<0.000000e+00> : vector<128xf32>
    %29 = vector.multi_reduction <add>, %25, %cst_9 [0] : vector<10x128xf32> to vector<128xf32>
    %30 = vector.shape_cast %29 : vector<128xf32> to vector<1x128xf32>
    %31 = arith.divf %28, %30 : vector<1x128xf32>
    %cst_10 = arith.constant 1.000000e+00 : f32
    %32 = vector.broadcast %cst_10 : f32 to vector<1x128xf32>
    %33 = arith.subf %32, %31 : vector<1x128xf32>
    %cst_11 = arith.constant 1.000000e-07 : f32
    %34 = vector.broadcast %cst_11 : f32 to vector<1x128xf32>
    %35 = arith.addf %33, %34 : vector<1x128xf32>
    %36 = math.log %35 : vector<1x128xf32>
    %cst_12 = arith.constant 0.000000e+00 : f32
    %37 = vector.broadcast %cst_12 : f32 to vector<1x128xf32>
    %38 = arith.subf %37, %36 : vector<1x128xf32>
    %39 = tpu.iota {dimensions = array<i32: 1>} : vector<1x128xi32>
    %c128_i32 = arith.constant 128 : i32
    %40 = arith.muli %arg0, %c128_i32 : i32
    %41 = vector.broadcast %40 : i32 to vector<1x128xi32>
    %42 = arith.addi %41, %39 : vector<1x128xi32>
    %c8_i32 = arith.constant 8 : i32
    %43 = vector.broadcast %c8_i32 : i32 to vector<1x128xi32>
    %44 = arith.cmpi slt, %42, %43 : vector<1x128xi32>
    %cst_13 = arith.constant 0.000000e+00 : f32
    %45 = vector.broadcast %cst_13 : f32 to vector<1x128xf32>
    %46 = arith.select %44, %38, %45 : vector<1x128xi1>, vector<1x128xf32>
    %c0_14 = arith.constant 0 : index
    %c0_15 = arith.constant 0 : index
    %47 = vector.load %arg4[%c0_14, %c0_15] : memref<1x128xf32, #tpu.memory_space<vmem>>, vector<1x128xf32>
    tpu.vector_store %arg4[%c0_14, %c0_15], %46 {strides = array<i32>} : memref<1x128xf32, #tpu.memory_space<vmem>>, vector<1x128xf32>,
    return
  }
  func.func @transform_0(%arg0: i32) -> (i32, i32) {
    %c0_i32 = arith.constant 0 : i32
    %c0_i32_0 = arith.constant 0 : i32
    return %c0_i32, %arg0 : i32, i32
  }
  func.func @transform_1(%arg0: i32) -> (i32, i32) {
    %c0_i32 = arith.constant 0 : i32
    %c0_i32_0 = arith.constant 0 : i32
    return %c0_i32, %arg0 : i32, i32
  }
  func.func @transform_2(%arg0: i32) -> (i32, i32) {
    %c0_i32 = arith.constant 0 : i32
    %c0_i32_0 = arith.constant 0 : i32
    %c0_i32_1 = arith.constant 0 : i32
    return %c0_i32, %c0_i32_0 : i32, i32
  }
  func.func @transform_3(%arg0: i32) -> (i32, i32) {
    %c0_i32 = arith.constant 0 : i32
    %c0_i32_0 = arith.constant 0 : i32
    return %c0_i32, %arg0 : i32, i32
  }
}

</mosaic_0001>

<bundles_post_ra>
// kernel: tpu_custom_call.1
= control target key start
LH: loop header
LB: loop body
LE: loop exit
PB: predicated region body
PF: predicated region fallthrough
CT: control target
= control target key end

     0   :  { %v182_v1 = vmov 0   ;;  %s229_s0 = inlined_call_operand.vmem [shape: f32[10,128], index: 0, kind: input, shape index: {}]   ;;  %s230_s1 = inlined_call_operand.vmem [shape: s32[1,128], index: 1, kind: input, shape index: {}]   ;;  %s231_s2 = inlined_call_operand.vmem [shape: f32[10,1], index: 2, kind: input, shape index: {}]   ;;  %s232_s3 = inlined_call_operand.hbm [shape: f32[1,128], index: 3, kind: output, shape index: {}]  }
   0x1   :  { %v29_v0 = vld [vmem:[%s231_s2 + $0x8] sm:$0x3]  ;;  %146 = vset.pattern.permute.xlu0 %v182_v1 }
   0x2   :  { %8 = vsyncpa [#allocation3], 0  ;;  %37 = vperm.xlu0 %146, %v29_v0   ;;  %v28_v2 = vld [vmem:[%s231_s2] sm:$0xff]  ;;  %vm42_vm0 = vcmask 1041408   ;;  %v16_v3 = vld [vmem:[%s229_s0 + $0x8] sm:$0x3]  ;;  %v18_v21 = vlaneseq }
   0x3   :  { %v15_v4 = vld [vmem:[%s229_s0] sm:$0xff]  ;;  %v63_v5 = vsel %vm42_vm0, %v16_v3, -inf  ;;  %v183_v29 = vmov 0.0   ;;  %vm54_vm3 = vcmp.gt.f32.partialorder %v16_v3, 0.0  ;;  %s130_s23 = sshll.u32 %s232_s3, 4  ;;  %s131_s23 = int_to_ptr.hbm [resolvable:$true] %s130_s23 }
   0x4   :  { %v64_v6 = vmax.f32 %v15_v4, %v63_v5  ;;  %v19_v23 = vshrl.u32 %v18_v21, 7  ;;  %v147_v26 = vld [vmem:[%s230_s1] ss:$0 sm:$0xff]  ;;  %vm53_vm4 = vcmp.gt.f32.partialorder %v15_v4, 0.0  ;;  %v142_v49 = vsel %vm54_vm3, 1.0, %v183_v29  ;;  %s184_s1 = smov [#allocation2]  }
   0x5   :  { %v141_v50 = vsel %vm53_vm4, 1.0, %v183_v29  ;;  %s128_s20 = sshll.u32 %s184_s1, 4  ;;  %s129_s20 = int_to_ptr.vmem [resolvable:$true] %s128_s20 }
   0x6   :  { %v65_v7 = vrot.slane %v64_v6, 4  ;;  %v20_v25 = vadd.s32 8, %v19_v23  ;;  %vm22_vm2 = vcmp.eq.s32.totalorder %v19_v23, %v147_v26 }
   0x7   :  { %v139_v33 = vsel %vm22_vm2, 1.0, %v183_v29 }
   0x8   :  { %v66_v8 = vmax.f32 %v64_v6, %v65_v7  ;;  %vm23_vm1 = vcmp.eq.s32.totalorder %v20_v25, %v147_v26  ;;  %v51_v47 = vsub.f32 1.0, %v139_v33 }
   0x9   :  { %v140_v30 = vsel %vm23_vm1, 1.0, %v183_v29 }
   0xa   :  { %32 = vperm.xlu0 %146, %v28_v2   ;;  %v67_v9 = vrot.slane %v66_v8, 2  ;;  %v52_v44 = vsub.f32 1.0, %v140_v30 }
   0xc   :  { %v68_v10 = vmax.f32 %v66_v8, %v67_v9 }
   0xe   :  { %v69_v11 = vrot.slane %v68_v10, 1 }
  0x10   :  { %v70_v12 = vmax.f32 %v68_v10, %v69_v11 }
  0x12   :  { %v71_v13 = vsub.f32 %v15_v4, %v70_v12  ;;  %v72_v14 = vsub.f32 %v16_v3, %v70_v12 }
  0x14   :  { %v75_v15 = vmul.f32 1.442695, %v72_v14  ;;  %v73_v16 = vmul.f32 1.442695, %v71_v13  ;;  %v116_v13 = vand.u32 127, %v18_v21 }
  0x16   :  { %148 = vpow2.f32 %v75_v15  ;;  %vm120_vm9 = vcmp.lt.s32.totalorder %v116_v13, 8 }
  0x17   :  { %150 = vpow2.f32 %v73_v16 }
  0x1c   :  { %v149_v17 = vpop.eup %148 }
  0x1d   :  { %v151_v18 = vpop.eup %150  ;;  %v87_v19 = vsel %vm42_vm0, %v149_v17, 0.0 }
  0x1e   :  { %v88_v20 = vadd.f32 %v151_v18, %v87_v19 }
  0x20   :  { %v89_v22 = vrot.slane %v88_v20, 4 }
  0x22   :  { %v90_v24 = vadd.f32 %v89_v22, %v88_v20 }
  0x24   :  { %v91_v27 = vrot.slane %v90_v24, 2 }
  0x26   :  { %v92_v31 = vadd.f32 %v91_v27, %v90_v24 }
  0x28   :  { %v93_v34 = vrot.slane %v92_v31, 1 }
  0x2a   :  { %v94_v38 = vadd.f32 %v93_v34, %v92_v31 }
  0x2c   :  { %152 = vrcp.f32 %v94_v38  ;;  %vm100_vm5 = vweird.f32 %v94_v38  ;;  %v106_v63 = vand.u32 2147483648, %v94_v38  ;;  %v104_v2 = vand.u32 2147483647, %v94_v38 }
  0x2e   :  { %v107_v4 = vor.u32 1.1754944e-38, %v106_v63  ;;  %vm105_vm8 = vcmp.eq.f32.partialorder %v104_v2, 8.507059e+37 }
  0x32   :  { %v153_v45 = vpop.eup %152 }
  0x33   :  { %v96_v51 = vmul.f32 %v153_v45, %v94_v38  ;;  %vm101_vm6 = vweird.f32 %v153_v45 }
  0x34   :  { %vm102_vm7 = vmor %vm100_vm5, %vm101_vm6 }
  0x35   :  { %v97_v56 = vsub.f32 1.0, %v96_v51 }
  0x37   :  { %v98_v61 = vmul.f32 %v153_v45, %v97_v56 }
  0x39   :  { %v99_v1 = vadd.f32 %v153_v45, %v98_v61 }
  0x3b   :  { %v103_v6 = vsel %vm102_vm7, %v153_v45, %v99_v1 }
  0x3c   :  { %v108_v8 = vsel %vm105_vm8, %v107_v4, %v103_v6 }
  0x74   :  { %v38_v28 = vpop.permute.xlu0 %37 }
  0x75   :  { %v41_v32 = vmul.f32 %v140_v30, %v38_v28 }
  0x77   :  { %v43_v37 = vsel %vm42_vm0, %v41_v32, 0.0 }
  0x7c   :  { %v33_v35 = vpop.permute.xlu0 %32 }
  0x7d   :  { %v40_v36 = vmul.f32 %v139_v33, %v33_v35 }
  0x7f   :  { %v44_v39 = vadd.f32 %v43_v37, %v40_v36 }
  0x81   :  { %v45_v40 = vrot.slane %v44_v39, 4 }
  0x83   :  { %v46_v41 = vadd.f32 %v45_v40, %v44_v39 }
  0x85   :  { %v47_v42 = vrot.slane %v46_v41, 2 }
  0x87   :  { %v48_v43 = vadd.f32 %v47_v42, %v46_v41 }
  0x89   :  { %v49_v46 = vrot.slane %v48_v43, 1 }
  0x8b   :  { %v50_v48 = vadd.f32 %v49_v46, %v48_v43 }
  0x8d   :  { %v59_v52 = vmul.f32 %v51_v47, %v50_v48  ;;  %v60_v53 = vmul.f32 %v52_v44, %v50_v48 }
  0x8f   :  { %v61_v54 = vmul.f32 %v141_v50, %v59_v52  ;;  %v62_v55 = vmul.f32 %v142_v49, %v60_v53 }
  0x91   :  { %v77_v57 = vmul.f32 %v151_v18, %v61_v54  ;;  %v78_v58 = vmul.f32 %v149_v17, %v62_v55 }
  0x93   :  { %v79_v59 = vsel %vm42_vm0, %v78_v58, 0.0 }
  0x94   :  { %v80_v60 = vadd.f32 %v79_v59, %v77_v57 }
  0x96   :  { %v81_v62 = vrot.slane %v80_v60, 4 }
  0x98   :  { %v82_v0 = vadd.f32 %v81_v62, %v80_v60 }
  0x9a   :  { %v83_v3 = vrot.slane %v82_v0, 2 }
  0x9c   :  { %v84_v5 = vadd.f32 %v83_v3, %v82_v0 }
  0x9e   :  { %v85_v7 = vrot.slane %v84_v5, 1 }
  0xa0   :  { %v86_v9 = vadd.f32 %v85_v7, %v84_v5 }
  0xa2   :  { %v109_v10 = vmul.f32 %v108_v8, %v86_v9 }
  0xa4   :  { %v110_v11 = vsub.f32 1.0, %v109_v10 }
  0xa6   :  { %v111_v12 = vadd.f32 1e-07, %v110_v11 }
  0xa8   :  { %154 = vlog2.f32 %v111_v12 }
  0xae   :  { %v155_v14 = vpop.eup %154 }
  0xaf   :  { %v113_v15 = vmul.f32 0.6931472, %v155_v14 }
  0xb1   :  { %v114_v16 = vsub.f32 0.0, %v113_v15 }
  0xb3   :  { %v121_v17 = vsel %vm120_vm9, %v114_v16, 0.0 }
  0xb4   :  { %122 = vst [vmem:[#allocation2] sm:$0x1] %v121_v17 }
  0xb5   :  { %133 = dma.vmem_to_hbm [thread:$0]  %s129_s20, 16, %s131_s23, [#allocation3]  }
  0xb6   :  { %180 = dma.done.wait [#allocation3], 16  }
  0xb7   :  { %181 = vsyncadd [#allocation3], 4294967280 }
  0xb8   :  { %138 = vsyncpa [#allocation3], 1 }

</bundles_post_ra>
